<compile_context>
chip_gen: v6e
topology: v6e:2x2x1
jax: 0.10.0
libtpu: 0.0.40
codegen_flags: <defaults>
</compile_context>

<pallas_src>
import functools

import jax
import jax.numpy as jnp
from jax import lax
from jax.experimental import pallas as pl
from jax.experimental.pallas import tpu as pltpu

_LANES = 512          # lane-dense layout (multiple of 128) -> unmasked vst
_LANES_LOG2 = 9
assert _LANES == 1 << _LANES_LOG2
_BLOCK_ROWS = 1024    # 1024 x 512 x 4 B = 2 MiB per f32 tile


def _lowbias32(x):
    """2-multiply integer mixer (lowbias32): u32 counter -> well-mixed u32."""
    x = x ^ (x >> 16)
    x = x * jnp.uint32(0x7FEB352D)
    x = x ^ (x >> 15)
    x = x * jnp.uint32(0x846CA68B)
    x = x ^ (x >> 16)
    return x


def _keep_threshold(p: float) -> int:
    """keep iff bits < round((1-p) * 2^32); clamped to 2^32-1 (2^-32 bias)."""
    return min(int(round((1.0 - float(p)) * 4294967296.0)), 4294967295)


def _reference_keep_mask(nnz: int, seed, keep_thresh: int):
    """Pure-jnp replica of the in-kernel mask (used for testing)."""
    gidx = jnp.arange(nnz, dtype=jnp.uint32)
    seed_mix = jnp.uint32(seed) * jnp.uint32(0x9E3779B9)
    return _lowbias32(gidx ^ seed_mix) < jnp.uint32(keep_thresh)


def _dropout_kernel(seed_ref, v_ref, o_ref, *, keep_thresh, scale,
                    block_rows, use_hw_prng):
    """Elementwise dropout on a (block_rows, _LANES) tile."""
    shape = o_ref.shape

    if use_hw_prng:
        # Preferred on v7x (hash would otherwise be the binding VALU slot):
        # per-tile independent stream by folding the grid step into the seed.
        pltpu.prng_seed(seed_ref[0], pl.program_id(0))
        bits = pltpu.bitcast(pltpu.prng_random_bits(shape), jnp.uint32)
    else:
        # Counter-based PRNG keyed on (seed, global flat element index):
        # identical results regardless of tiling; each tile independent.
        row = lax.broadcasted_iota(jnp.int32, shape, 0)
        col = lax.broadcasted_iota(jnp.int32, shape, 1)
        base = pl.program_id(0) * block_rows                  # scalar (sreg)
        # _LANES is a power of two: "* lanes + col" -> "<< 9 | col".
        # int32 math may wrap for nnz >= 2^31; the wrap is bijective mod 2^32
        # so the resulting mask is still a valid Bernoulli mask.
        gidx = ((base + row) << _LANES_LOG2) | col
        seed = seed_ref[0].astype(jnp.uint32) * jnp.uint32(0x9E3779B9)  # scalar
        bits = _lowbias32(gidx.astype(jnp.uint32) ^ seed)

    # Integer threshold compare on raw u32 bits: keep with prob (1 - p).
    keep = bits < jnp.uint32(keep_thresh)

    v = v_ref[...].astype(jnp.float32)
    o_ref[...] = jnp.where(keep, v * jnp.float32(scale),
                           jnp.float32(0.0)).astype(o_ref.dtype)


def _dropout_values(values: jax.Array, p: float, seed,
                    *, use_hw_prng: bool = False) -> jax.Array:
    """Run the Pallas dropout kernel over a 1-D values vector."""
    nnz = values.shape[0]
    if nnz == 0:
        return values
    if p >= 1.0:
        return jnp.zeros_like(values)

    rows = pl.cdiv(nnz, _LANES)
    padded = rows * _LANES

    # block_rows: multiple of 8 (or == full rows dim), sized so the grid has
    # >= 2 steps whenever possible (second TensorCore on v7x), capped at 2 MiB.
    if rows <= 8:
        block_rows = rows
    else:
        block_rows = min(_BLOCK_ROWS, ((pl.cdiv(rows, 2) + 7) // 8) * 8)
    grid = pl.cdiv(rows, block_rows)

    if padded == nnz:
        v2d = values.reshape(rows, _LANES)   # exact-size reshape: no copy
        io_alias = {}                        # don't alias a view of the caller's buffer
    else:
        # Tail-only padding (< _LANES elements of actual new data, but a full
        # copy in XLA).  See module docstring for why this is kept for ragged
        # nnz instead of a rank-1 kernel.
        v2d = jnp.pad(values, (0, padded - nnz)).reshape(rows, _LANES)
        io_alias = {1: 0}                    # fresh buffer -> write in place

    seed_arr = jnp.asarray(seed, dtype=jnp.int32).reshape(1)
    keep_thresh = _keep_threshold(p)
    scale = 1.0 / (1.0 - float(p))

    out2d = pl.pallas_call(
        functools.partial(_dropout_kernel, keep_thresh=keep_thresh,
                          scale=scale, block_rows=block_rows,
                          use_hw_prng=use_hw_prng),
        out_shape=jax.ShapeDtypeStruct((rows, _LANES), values.dtype),
        grid=(grid,),
        in_specs=[
            pl.BlockSpec(memory_space=pltpu.SMEM),               # seed scalar
            pl.BlockSpec((block_rows, _LANES), lambda i: (i, 0)),
        ],
        out_specs=pl.BlockSpec((block_rows, _LANES), lambda i: (i, 0)),
        input_output_aliases=io_alias,
        compiler_params=pltpu.CompilerParams(
            dimension_semantics=("parallel",)),                  # 2-TC on v7x
    )(seed_arr, v2d)

    flat = out2d.reshape(-1)
    return flat if padded == nnz else flat[:nnz]


def sparse_dropout(indices: jax.Array,
                   values: jax.Array,
                   dense_shape: tuple,
                   p: float,
                   *,
                   training: bool = True,
                   seed=0,
                   use_hw_prng: bool = False):
    """JAX/Pallas equivalent of SparseDropout.forward.

    Returns (indices, new_values, dense_shape), matching
    torch.sparse.FloatTensor(indices, drop_val, input.shape).
    Pass a fresh `seed` (python int or jax int scalar) each training step.
    """
    # TODO(synk): coalesce() (duplicate-index summation) is assumed to have
    # been done by the caller; indices/values are passed through as-is.
    if (not training) or p == 0.0:
        return indices, values, dense_shape   # F.dropout identity in eval / p==0
    drop_val = _dropout_values(values, p, seed, use_hw_prng=use_hw_prng)
    return indices, drop_val, dense_shape


if __name__ == "__main__":
    key = jax.random.PRNGKey(0)
    k_idx_r, k_idx_c, k_val, k_val2 = jax.random.split(key, 4)

    # Small deterministic sparse input: dense shape (16, 16) with nnz=48.
    dense_shape = (16, 16)
    nnz = 48
    rows_i = jax.random.randint(k_idx_r, (nnz,), 0, dense_shape[0], dtype=jnp.int32)
    cols_i = jax.random.randint(k_idx_c, (nnz,), 0, dense_shape[1], dtype=jnp.int32)
    indices = jnp.stack([rows_i, cols_i], axis=0)            # [2, nnz]
    values = jax.random.normal(k_val, (nnz,), dtype=jnp.float32)

    p, seed = 0.5, 1234
    scale = 1.0 / (1.0 - p)
    thresh = _keep_threshold(p)

    out_indices, out_values, out_shape = sparse_dropout(
        indices, values, dense_shape, p, training=True, seed=seed)
    jax.block_until_ready(out_values)

    # Exact check against a pure-jnp replica of the in-kernel mask
    # (avoids misclassifying values that are exactly 0 as "dropped").
    expected = jnp.where(_reference_keep_mask(nnz, seed, thresh),
                         values * scale, 0.0)
    assert out_values.shape == values.shape
    assert out_values.dtype == values.dtype
    assert out_indices.shape == indices.shape
    assert bool(jnp.allclose(out_values, expected, rtol=1e-6, atol=1e-6))

    # Larger case: exercises the no-pad fast path (nnz % 512 == 0), a
    # multiple-of-8 block_rows and a >= 2-step parallel grid.
    nnz2 = 24 * _LANES
    values2 = jax.random.normal(k_val2, (nnz2,), dtype=jnp.float32)
    out_values2 = _dropout_values(values2, p, seed)
    jax.block_until_ready(out_values2)
    expected2 = jnp.where(_reference_keep_mask(nnz2, seed, thresh),
                          values2 * scale, 0.0)
    assert bool(jnp.allclose(out_values2, expected2, rtol=1e-6, atol=1e-6))

    # Eval mode and p == 0 are identity.
    _, eval_values, _ = sparse_dropout(indices, values, dense_shape, p,
                                       training=False, seed=seed)
    assert bool(jnp.array_equal(eval_values, values))
    _, p0_values, _ = sparse_dropout(indices, values, dense_shape, 0.0,
                                     training=True, seed=seed)
    assert bool(jnp.array_equal(p0_values, values))

    print("KERNEL_OK")
</pallas_src>

<mosaic_0001>
module attributes {stable_mosaic.version = 11 : i64} {
  func.func @_dropout_kernel(%arg0: i32, %arg1: memref<1xi32, #tpu.memory_space<smem>>, %arg2: memref<1x512xf32, #tpu.memory_space<vmem>>, %arg3: memref<1x512xf32, #tpu.memory_space<vmem>>) attributes {dimension_semantics = [#tpu.dimension_semantics<parallel>], iteration_bounds = array<i64: 1>, scalar_prefetch = 0 : i64, scratch_operands = 0 : i64, tpu.core_type = #tpu.core_type<tc>, window_params = [{transform_indices = @transform_0, window_bounds = array<i64: 1>}, {transform_indices = @transform_1, window_bounds = array<i64: 1, 512>}, {transform_indices = @transform_2, window_bounds = array<i64: 1, 512>}]} {
    %0 = tpu.iota {dimensions = array<i32: 0>} : vector<1x512xi32>
    %1 = tpu.iota {dimensions = array<i32: 1>} : vector<1x512xi32>
    %c1_i32 = arith.constant 1 : i32
    %2 = arith.muli %arg0, %c1_i32 : i32
    %3 = vector.broadcast %2 : i32 to vector<1x512xi32>
    %4 = arith.addi %3, %0 : vector<1x512xi32>
    %c9_i32 = arith.constant 9 : i32
    %5 = vector.broadcast %c9_i32 : i32 to vector<1x512xi32>
    %6 = arith.shli %4, %5 : vector<1x512xi32>
    %7 = arith.ori %6, %1 : vector<1x512xi32>
    %c0 = arith.constant 0 : index
    %8 = memref.load %arg1[%c0] : memref<1xi32, #tpu.memory_space<smem>>
    %c-1640531527_i32 = arith.constant -1640531527 : i32
    %9 = arith.muli %8, %c-1640531527_i32 : i32
    %10 = vector.broadcast %9 : i32 to vector<1x512xi32>
    %11 = arith.xori %7, %10 : vector<1x512xi32>
    %c16_i32 = arith.constant 16 : i32
    %12 = vector.broadcast %c16_i32 : i32 to vector<1x512xi32>
    %13 = arith.shrui %11, %12 : vector<1x512xi32>
    %14 = arith.xori %11, %13 : vector<1x512xi32>
    %c2146121005_i32 = arith.constant 2146121005 : i32
    %15 = vector.broadcast %c2146121005_i32 : i32 to vector<1x512xi32>
    %16 = arith.muli %14, %15 : vector<1x512xi32>
    %c15_i32 = arith.constant 15 : i32
    %17 = vector.broadcast %c15_i32 : i32 to vector<1x512xi32>
    %18 = arith.shrui %16, %17 : vector<1x512xi32>
    %19 = arith.xori %16, %18 : vector<1x512xi32>
    %c-2073254261_i32 = arith.constant -2073254261 : i32
    %20 = vector.broadcast %c-2073254261_i32 : i32 to vector<1x512xi32>
    %21 = arith.muli %19, %20 : vector<1x512xi32>
    %c16_i32_0 = arith.constant 16 : i32
    %22 = vector.broadcast %c16_i32_0 : i32 to vector<1x512xi32>
    %23 = arith.shrui %21, %22 : vector<1x512xi32>
    %24 = arith.xori %21, %23 : vector<1x512xi32>
    %c-2147483648_i32 = arith.constant -2147483648 : i32
    %25 = vector.broadcast %c-2147483648_i32 : i32 to vector<1x512xi32>
    %26 = arith.cmpi ult, %24, %25 : vector<1x512xi32>
    %c0_1 = arith.constant 0 : index
    %c0_2 = arith.constant 0 : index
    %27 = vector.load %arg2[%c0_1, %c0_2] : memref<1x512xf32, #tpu.memory_space<vmem>>, vector<1x512xf32>
    %cst = arith.constant 2.000000e+00 : f32
    %28 = vector.broadcast %cst : f32 to vector<1x512xf32>
    %29 = arith.mulf %27, %28 : vector<1x512xf32>
    %cst_3 = arith.constant 0.000000e+00 : f32
    %30 = vector.broadcast %cst_3 : f32 to vector<1x512xf32>
    %31 = arith.select %26, %29, %30 : vector<1x512xi1>, vector<1x512xf32>
    %c0_4 = arith.constant 0 : index
    %c0_5 = arith.constant 0 : index
    %32 = vector.load %arg3[%c0_4, %c0_5] : memref<1x512xf32, #tpu.memory_space<vmem>>, vector<1x512xf32>
    tpu.vector_store %arg3[%c0_4, %c0_5], %31 {strides = array<i32>} : memref<1x512xf32, #tpu.memory_space<vmem>>, vector<1x512xf32>,
    return
  }
  func.func @transform_0(%arg0: i32) -> i32 {
    %c0_i32 = arith.constant 0 : i32
    %c0_i32_0 = arith.constant 0 : i32
    return %c0_i32 : i32
  }
  func.func @transform_1(%arg0: i32) -> (i32, i32) {
    %c0_i32 = arith.constant 0 : i32
    %c0_i32_0 = arith.constant 0 : i32
    return %arg0, %c0_i32 : i32, i32
  }
  func.func @transform_2(%arg0: i32) -> (i32, i32) {
    %c0_i32 = arith.constant 0 : i32
    %c0_i32_0 = arith.constant 0 : i32
    return %arg0, %c0_i32 : i32, i32
  }
}

</mosaic_0001>

<bundles_post_ra>
// kernel: tpu_custom_call.1
= control target key start
LH: loop header
LB: loop body
LE: loop exit
PB: predicated region body
PF: predicated region fallthrough
CT: control target
= control target key end

     0   :  { %8 = vsyncpa [#allocation4], 0  ;;  %s235_s0 = inlined_call_operand.<no memory space> [shape: s32[1], index: 0, kind: input, shape index: {}]   ;;  %s236_s1 = inlined_call_operand.hbm [shape: f32[1,512], index: 1, kind: input, shape index: {}, may-alias: {1,2}]   ;;  %s237_s2 = inlined_call_operand.hbm [shape: f32[1,512], index: 2, kind: output, shape index: {}, may-alias: {1,2}]  }
   0x1   :  { %9 = vsyncpa [#allocation5], 0  ;;  %s205_s9 = smov [#allocation3]  }
   0x2   :  { %s18_s10 = sshll.u32 %s205_s9, 4  ;;  %s19_s10 = int_to_ptr.vmem [resolvable:$true] %s18_s10 }
   0x3   :  { %s169_s11 = scalar_lea.vmem %s19_s10, 64  ;;  %p174_p1 = scmp.lt.s32.totalorder %s19_s10, %s19_s10 }
   0x4   :  { %p170_p0 = scmp.ne.s32.totalorder %s19_s10, %s169_s11  ;;  %p175_p2 = scmp.lt.s32.totalorder %s169_s11, %s169_s11 }
   0x6   :  { %p176_p3 = por %p175_p2, %p174_p1 }
   0x8   :  { %p177_p4 = pnand %p176_p3, %p170_p0 }
   0xa   :  { %180 = shalt.err (!%p177_p4)
}
   0xb   :  { %21 = dma.hbm_to_vmem [thread:$0]  %s236_s1, 64, %s19_s10, [#allocation4]  }
   0xc   :  { %201 = dma.done.wait [#allocation4], 64  }
   0xd   :  { %202 = vsyncadd [#allocation4], 4294967232  ;;  %v25_v0 = vlaneseq  ;;  %s40_s16 = smul.u32 2654435769, %s235_s0  ;;  %v82_v28 = vld [vmem:[#allocation3] sm:$0xf] }
   0xe   :  { %v206_v36 = vmov 1966171168   ;;  %v83_v38 = vmul.f32 2.0, %v82_v28  ;;  %s207_s0 = smov [#allocation6]  }
   0xf   :  { %v26_v1 = vshrl.u32 %v25_v0, 7  ;;  %v28_v2 = vand.u32 127, %v25_v0  ;;  %v41_v7 = vstv %s40_s16  ;;  %v116_v37 = vunpack.c.l.s4 %v206_v36  ;;  %s149_s1 = sshll.u32 %s207_s0, 4  ;;  %s150_s1 = int_to_ptr.vmem [resolvable:$true] %s149_s1 }
  0x10   :  { %vm140_vm4 = vcmp.lt.s32.totalorder %v25_v0, 512  ;;  %s181_s17 = scalar_lea.vmem %s150_s1, 64  ;;  %p186_p6 = scmp.lt.s32.totalorder %s150_s1, %s150_s1 }
  0x11   :  { %v29_v3 = vadd.s32 128, %v28_v2  ;;  %v30_v4 = vadd.s32 256, %v28_v2  ;;  %v31_v5 = vadd.s32 384, %v28_v2  ;;  %v34_v6 = vshll.u32 %v26_v1, 9  ;;  %p182_p5 = scmp.ne.s32.totalorder %s150_s1, %s181_s17  ;;  %p187_p7 = scmp.lt.s32.totalorder %s181_s17, %s181_s17 }
  0x12   :  { %v87_v35 = vsub.s32 0, %v26_v1  ;;  %v91_v41 = vsub.s32 1, %v26_v1  ;;  %v95_v44 = vsub.s32 2, %v26_v1  ;;  %v99_v45 = vsub.s32 3, %v26_v1 }
  0x13   :  { %v35_v8 = vor.u32 %v34_v6, %v28_v2  ;;  %v36_v9 = vor.u32 %v34_v6, %v29_v3  ;;  %v37_v10 = vor.u32 %v34_v6, %v30_v4  ;;  %v38_v11 = vor.u32 %v34_v6, %v31_v5  ;;  %p188_p8 = por %p187_p7, %p186_p6 }
  0x14   :  { %v117_v50 = vunpack.c.0.s8 %v116_v37  ;;  %v88_v53 = vrot.slane %v83_v38, %v87_v35  ;;  %v92_v54 = vrot.slane %v83_v38, %v91_v41  ;;  %v96_v57 = vrot.slane %v83_v38, %v95_v44 }
  0x15   :  { %v42_v12 = vxor.u32 %v41_v7, %v35_v8  ;;  %v43_v13 = vxor.u32 %v41_v7, %v36_v9  ;;  %v44_v14 = vxor.u32 %v41_v7, %v37_v10  ;;  %v45_v15 = vxor.u32 %v41_v7, %v38_v11  ;;  %p189_p9 = pnand %p188_p8, %p182_p5 }
  0x16   :  { %v100_v58 = vrot.slane %v83_v38, %v99_v45  ;;  %v120_v61 = vsub.s32 %v117_v50, %v26_v1 }
  0x17   :  { %v46_v16 = vshrl.u32 %v42_v12, 16  ;;  %v47_v17 = vshrl.u32 %v43_v13, 16  ;;  %v48_v18 = vshrl.u32 %v44_v14, 16  ;;  %v49_v19 = vshrl.u32 %v45_v15, 16 }
  0x19   :  { %v50_v20 = vxor.u32 %v46_v16, %v42_v12  ;;  %v51_v21 = vxor.u32 %v47_v17, %v43_v13  ;;  %v52_v22 = vxor.u32 %v48_v18, %v44_v14  ;;  %v53_v23 = vxor.u32 %v49_v19, %v45_v15 }
  0x1b   :  { %v54_v24 = vmul.u32 2146121005, %v50_v20  ;;  %v55_v25 = vmul.u32 2146121005, %v51_v21 }
  0x1c   :  { %v56_v26 = vmul.u32 2146121005, %v52_v22  ;;  %v57_v27 = vmul.u32 2146121005, %v53_v23 }
  0x1d   :  { %v58_v29 = vshrl.u32 %v54_v24, 15  ;;  %v59_v30 = vshrl.u32 %v55_v25, 15 }
  0x1e   :  { %v60_v31 = vshrl.u32 %v56_v26, 15  ;;  %v61_v32 = vshrl.u32 %v57_v27, 15 }
  0x1f   :  { %v62_v33 = vxor.u32 %v58_v29, %v54_v24  ;;  %v63_v34 = vxor.u32 %v59_v30, %v55_v25 }
  0x20   :  { %v64_v39 = vxor.u32 %v60_v31, %v56_v26  ;;  %v65_v40 = vxor.u32 %v61_v32, %v57_v27 }
  0x21   :  { %v66_v42 = vmul.u32 2221713035, %v62_v33  ;;  %v67_v43 = vmul.u32 2221713035, %v63_v34 }
  0x22   :  { %v68_v46 = vmul.u32 2221713035, %v64_v39  ;;  %v69_v47 = vmul.u32 2221713035, %v65_v40 }
  0x23   :  { %v70_v48 = vshrl.u32 %v66_v42, 16  ;;  %v71_v49 = vshrl.u32 %v67_v43, 16 }
  0x24   :  { %v72_v51 = vshrl.u32 %v68_v46, 16  ;;  %v73_v52 = vshrl.u32 %v69_v47, 16 }
  0x25   :  { %v74_v55 = vxor.u32 %v70_v48, %v66_v42  ;;  %v75_v56 = vxor.u32 %v71_v49, %v67_v43 }
  0x26   :  { %v76_v59 = vxor.u32 %v72_v51, %v68_v46  ;;  %v77_v60 = vxor.u32 %v73_v52, %v69_v47 }
  0x27   :  { %vm78_vm0 = vcmp.lt.u32.totalorder %v74_v55, 2147483648  ;;  %vm79_vm1 = vcmp.lt.u32.totalorder %v75_v56, 2147483648 }
  0x28   :  { %vm80_vm2 = vcmp.lt.u32.totalorder %v76_v59, 2147483648  ;;  %vm81_vm3 = vcmp.lt.u32.totalorder %v77_v60, 2147483648  ;;  %v105_v62 = vsel %vm78_vm0, %v88_v53, 0.0  ;;  %v106_v63 = vsel %vm79_vm1, %v92_v54, 0.0 }
  0x29   :  { %v107_v2 = vsel %vm80_vm2, %v96_v57, 0.0  ;;  %v108_v3 = vsel %vm81_vm3, %v100_v58, 0.0  ;;  %v113_v4 = vcombine.low %v105_v62, %v106_v63 }
  0x2a   :  { %v114_v5 = vcombine.low %v107_v2, %v108_v3 }
  0x2b   :  { %v121_v6 = vrot.slane %v113_v4, %v120_v61 }
  0x2c   :  { %v128_v7 = vrot.slane %v114_v5, %v120_v61 }
  0x2e   :  { %v129_v8 = vcombine.low %v121_v6, %v128_v7 }
  0x30   :  { %v136_v9 = vrot.slane %v129_v8, %v120_v61 }
  0x32   :  { %142 = vst.msk [vmem:[#allocation6] sm:$0xf] %vm140_vm4, %v136_v9 }
  0x33   :  { %192 = shalt.err (!%p189_p9)
}
  0x34   :  { %152 = dma.vmem_to_hbm [thread:$0]  %s150_s1, 64, %s237_s2, [#allocation5]  }
  0x35   :  { %203 = dma.done.wait [#allocation5], 64  }
  0x36   :  { %204 = vsyncadd [#allocation5], 4294967232 }
  0x37   :  { %156 = vsyncpa [#allocation4], 1 }
  0x38   :  { %157 = vsyncpa [#allocation5], 1 }

</bundles_post_ra>
